<compile_context>
chip_gen: v6e
topology: v6e:2x2x1
jax: 0.10.0
libtpu: 0.0.40
codegen_flags: <defaults>
</compile_context>

<pallas_src>
import functools
import math

import jax
import jax.numpy as jnp
from jax import lax
from jax.experimental import pallas as pl
from jax.experimental.pallas import tpu as pltpu


# Weights whose bf16 footprint is below this stay fully resident in VMEM.
_RESIDENT_WEIGHT_BUDGET = 16 * 1024 * 1024


def _pick_tile(dim, pref, align):
    """Largest tile <= pref (halving) that divides dim; else the full dim."""
    t = pref
    while t >= align:
        if dim % t == 0:
            return t
        t //= 2
    # Full dim is always a legal block (full-dim exemption from (8,128) rule).
    # TODO(synk): for very large ragged dims this can exceed VMEM; a padded
    # tile + masking path would be needed there.
    return dim


def _vmem_limit_bytes():
    """Scoped VMEM limit: ~3/4 of physical capacity, safe on v5e/v6e/v7x."""
    try:
        cap = int(pltpu.get_tpu_info().vmem_capacity_bytes)
        return min(int(cap * 3 // 4), 100 * 1024 * 1024)
    except Exception:
        return 48 * 1024 * 1024


# ----------------------------------------------------------------------------
# Kernel 1a: weight-resident linear  y = x @ W + b  (single pass over K)
# ----------------------------------------------------------------------------
def _linear_resident_kernel(x_ref, w_ref, b_ref, o_ref):
    acc = jnp.dot(x_ref[...], w_ref[...], preferred_element_type=jnp.float32)
    o_ref[...] = (acc + b_ref[...].astype(jnp.float32)).astype(o_ref.dtype)


# ----------------------------------------------------------------------------
# Kernel 1b: tiled K-reduction linear (fallback for very large weights)
# ----------------------------------------------------------------------------
def _linear_tiled_kernel(x_ref, w_ref, b_ref, o_ref, acc_ref):
    k = pl.program_id(2)

    @pl.when(k == 0)
    def _():
        acc_ref[...] = jnp.zeros_like(acc_ref)

    acc_ref[...] += jnp.dot(x_ref[...], w_ref[...],
                            preferred_element_type=jnp.float32)

    @pl.when(k == pl.num_programs(2) - 1)
    def _():
        o_ref[...] = (acc_ref[...] + b_ref[...].astype(jnp.float32)
                      ).astype(o_ref.dtype)


def linear(x2d, w, b, out_dtype, *, tm_pref=512, tn_pref=1024, tk_pref=512):
    """x2d: (M, K), w: (K, N), b: (1, N) f32 -> (M, N) out_dtype."""
    M, K = x2d.shape
    Kw, N = w.shape
    assert K == Kw

    x2d = x2d.astype(jnp.bfloat16)
    w = w.astype(jnp.bfloat16)
    vmem_limit = _vmem_limit_bytes()

    if K * N * 2 <= _RESIDENT_WEIGHT_BUDGET:
        # Weight-resident single K pass: x and out streamed exactly once.
        tm = _pick_tile(M, tm_pref, 16)
        return pl.pallas_call(
            _linear_resident_kernel,
            out_shape=jax.ShapeDtypeStruct((M, N), out_dtype),
            grid=(M // tm,),
            in_specs=[
                pl.BlockSpec((tm, K), lambda i: (i, 0)),
                pl.BlockSpec((K, N), lambda i: (0, 0)),   # resident weight
                pl.BlockSpec((1, N), lambda i: (0, 0)),
            ],
            out_specs=pl.BlockSpec((tm, N), lambda i: (i, 0)),
            compiler_params=pltpu.CompilerParams(
                dimension_semantics=("parallel",),
                vmem_limit_bytes=vmem_limit),
        )(x2d, w, b)

    # Fallback: tiled K-reduction matmul.
    tm = _pick_tile(M, tm_pref, 16)
    tn = _pick_tile(N, tn_pref, 128)
    tk = _pick_tile(K, tk_pref, 128)
    grid = (M // tm, N // tn, K // tk)
    return pl.pallas_call(
        _linear_tiled_kernel,
        out_shape=jax.ShapeDtypeStruct((M, N), out_dtype),
        grid=grid,
        in_specs=[
            pl.BlockSpec((tm, tk), lambda i, j, k: (i, k)),
            pl.BlockSpec((tk, tn), lambda i, j, k: (k, j)),
            pl.BlockSpec((1, tn), lambda i, j, k: (0, j)),
        ],
        out_specs=pl.BlockSpec((tm, tn), lambda i, j, k: (i, j)),
        scratch_shapes=[pltpu.VMEM((tm, tn), jnp.float32)],
        compiler_params=pltpu.CompilerParams(
            dimension_semantics=("parallel", "parallel", "arbitrary"),
            vmem_limit_bytes=vmem_limit),
    )(x2d, w, b)


# ----------------------------------------------------------------------------
# Kernel 2: flash-style causal attention, one (batch, head, q-block) at a time
# ----------------------------------------------------------------------------
def _flash_attn_kernel(q_ref, k_ref, v_ref, o_ref, m_ref, l_ref, acc_ref, *,
                       scale):
    qi = pl.program_id(2)
    ki = pl.program_id(3)

    @pl.when(ki == 0)
    def _():
        m_ref[...] = jnp.full_like(m_ref, -jnp.inf)
        l_ref[...] = jnp.zeros_like(l_ref)
        acc_ref[...] = jnp.zeros_like(acc_ref)

    def online_update(mask_diagonal):
        q = q_ref[...] * scale                       # fold 1/sqrt(hd) into Q
        # QK^T contracting last dims -> no XLU transpose of K.
        s = lax.dot_general(q, k_ref[...],
                            dimension_numbers=(((1,), (1,)), ((), ())),
                            preferred_element_type=jnp.float32)  # (tq, tk) f32
        if mask_diagonal:
            # tq == tk and ki == qi, so the causal mask is block-local.
            tq, tk = s.shape
            row = lax.broadcasted_iota(jnp.int32, (tq, tk), 0)
            col = lax.broadcasted_iota(jnp.int32, (tq, tk), 1)
            s = jnp.where(col <= row, s, jnp.float32(-1e30))
        m_prev = m_ref[...]
        m_new = jnp.maximum(m_prev, s.max(axis=-1, keepdims=True))
        alpha = jnp.exp(m_prev - m_new)
        p = jnp.exp(s - m_new)
        l_ref[...] = alpha * l_ref[...] + p.sum(axis=-1, keepdims=True)
        acc_ref[...] = alpha * acc_ref[...] + lax.dot_general(
            p.astype(v_ref.dtype), v_ref[...],
            dimension_numbers=(((1,), (0,)), ((), ())),
            preferred_element_type=jnp.float32)
        m_ref[...] = m_new

    # Strictly-below-diagonal KV blocks: no mask work at all.
    @pl.when(ki < qi)
    def _():
        online_update(mask_diagonal=False)

    # Diagonal block: mask, then normalize + store (last contributing block).
    @pl.when(ki == qi)
    def _():
        online_update(mask_diagonal=True)
        inv_l = pl.reciprocal(l_ref[...], approx=True)
        o_ref[...] = (acc_ref[...] * inv_l).astype(o_ref.dtype)

    # ki > qi: fully-masked upper-triangle step -> no compute, and (thanks to
    # the clamped K/V index_map) no DMA either.
    # TODO(synk): remove these near-empty grid steps entirely with a
    # balanced-causal q-block pairing; they now only cost per-step overhead.


def causal_attention(q, k, v, *, blk_pref=512):
    """q, k, v: (B, H, T, hd) bf16 -> (B, H, T, hd) bf16."""
    B, H, T, hd = q.shape
    blk = _pick_tile(T, blk_pref, 16)   # tq == tk so diag-block logic is exact
    n_blk = T // blk
    scale = 1.0 / math.sqrt(hd)

    q_spec = pl.BlockSpec((None, None, blk, hd),
                          lambda b, h, qi, ki: (b, h, qi, 0))
    # Clamp the K/V block index to the diagonal: for ki > qi the block index is
    # unchanged from the previous step, so Pallas issues no new DMA for the
    # fully-masked upper triangle.
    kv_spec = pl.BlockSpec((None, None, blk, hd),
                           lambda b, h, qi, ki: (b, h, jnp.minimum(ki, qi), 0))

    return pl.pallas_call(
        functools.partial(_flash_attn_kernel, scale=float(scale)),
        out_shape=jax.ShapeDtypeStruct((B, H, T, hd), q.dtype),
        grid=(B, H, n_blk, n_blk),
        in_specs=[q_spec, kv_spec, kv_spec],
        out_specs=pl.BlockSpec((None, None, blk, hd),
                               lambda b, h, qi, ki: (b, h, qi, 0)),
        scratch_shapes=[
            pltpu.VMEM((blk, 1), jnp.float32),   # running max m
            pltpu.VMEM((blk, 1), jnp.float32),   # running denom l
            pltpu.VMEM((blk, hd), jnp.float32),  # running accumulator
        ],
        compiler_params=pltpu.CompilerParams(
            dimension_semantics=("parallel", "parallel", "parallel",
                                 "arbitrary"),
            vmem_limit_bytes=_vmem_limit_bytes()),
    )(q, k, v)


# ----------------------------------------------------------------------------
# Kernel 3: fused c_proj reading the attention output in (B, H, T, hd) layout
# ----------------------------------------------------------------------------
def _proj_heads_kernel(y_ref, w_ref, b_ref, o_ref, acc_ref):
    n_head = y_ref.shape[0]
    acc_ref[...] = jnp.zeros_like(acc_ref)
    for h in range(n_head):  # static unroll; n_head is small
        acc_ref[...] += jnp.dot(y_ref[h], w_ref[h],
                                preferred_element_type=jnp.float32)
    o_ref[...] = (acc_ref[...] + b_ref[...].astype(jnp.float32)
                  ).astype(o_ref.dtype)


def proj_from_heads(y, w, b, out_dtype, *, tm_pref=256):
    """y: (B, H, T, hd), w: (C, C), b: (1, C) -> (B, T, C).

    Reads the attention output directly in head-major layout so the wrapper
    never materializes the (B, T, C) transpose in HBM.  The weight is kept
    resident in VMEM as (H, hd, C) (free, contiguous reshape of (C, C)).
    """
    B, H, T, hd = y.shape
    C = H * hd
    Cw, N = w.shape
    assert Cw == C
    w3 = w.astype(jnp.bfloat16).reshape(H, hd, N)
    y = y.astype(jnp.bfloat16)

    tm = _pick_tile(T, tm_pref, 16)
    grid = (B, T // tm)

    return pl.pallas_call(
        _proj_heads_kernel,
        out_shape=jax.ShapeDtypeStruct((B, T, N), out_dtype),
        grid=grid,
        in_specs=[
            pl.BlockSpec((None, H, tm, hd), lambda bi, ti: (bi, 0, ti, 0)),
            pl.BlockSpec((H, hd, N), lambda bi, ti: (0, 0, 0)),  # resident w
            pl.BlockSpec((1, N), lambda bi, ti: (0, 0)),
        ],
        out_specs=pl.BlockSpec((None, tm, N), lambda bi, ti: (bi, ti, 0)),
        scratch_shapes=[pltpu.VMEM((tm, N), jnp.float32)],
        compiler_params=pltpu.CompilerParams(
            dimension_semantics=("parallel", "parallel"),
            vmem_limit_bytes=_vmem_limit_bytes()),
    )(y, w3, b)


# ----------------------------------------------------------------------------
# Full module forward
# ----------------------------------------------------------------------------
@functools.partial(jax.jit, static_argnames=("n_head",))
def causal_self_attention(x, params, *, n_head):
    B, T, C = x.shape
    assert C % n_head == 0
    hd = C // n_head

    # c_attn: (B*T, C) @ (C, 3C) + b -> bf16 qkv
    x2d = x.reshape(B * T, C)
    qkv = linear(x2d, params["w_attn"], params["b_attn"],
                 out_dtype=jnp.bfloat16)                 # (B*T, 3C)

    # Split into heads (matches PyTorch split + view + transpose).
    # TODO(synk): with hd % 128 == 0 the q/k/v head split could be folded into
    # the attention BlockSpecs (head-indexed column blocks of the qkv buffer);
    # with hd < 128 the lane-slice alignment rule makes the explicit transpose
    # the safe choice.
    qkv = qkv.reshape(B, T, 3, n_head, hd)
    q = qkv[:, :, 0].transpose(0, 2, 1, 3)               # (B, H, T, hd)
    k = qkv[:, :, 1].transpose(0, 2, 1, 3)
    v = qkv[:, :, 2].transpose(0, 2, 1, 3)

    y = causal_attention(q, k, v)                        # (B, H, T, hd) bf16
    # attn_dropout / resid_dropout are identity in inference mode (p = 0).

    if C * C * 2 <= _RESIDENT_WEIGHT_BUDGET:
        # Fused c_proj: consume y directly in head layout (no HBM transpose).
        out = proj_from_heads(y, params["w_proj"], params["b_proj"],
                              out_dtype=x.dtype)         # (B, T, C)
    else:
        y2d = y.transpose(0, 2, 1, 3).reshape(B * T, C)
        out = linear(y2d, params["w_proj"], params["b_proj"],
                     out_dtype=x.dtype).reshape(B, T, C)
    return out


def init_params(key, n_embd):
    k1, k2 = jax.random.split(key)
    # GPT-style deterministic init: normal(0, 0.02) weights, zero biases.
    w_attn = (jax.random.normal(k1, (n_embd, 3 * n_embd), jnp.float32)
              * 0.02).astype(jnp.bfloat16)
    w_proj = (jax.random.normal(k2, (n_embd, n_embd), jnp.float32)
              * 0.02).astype(jnp.bfloat16)
    b_attn = jnp.zeros((1, 3 * n_embd), jnp.float32)
    b_proj = jnp.zeros((1, n_embd), jnp.float32)
    return {"w_attn": w_attn, "b_attn": b_attn,
            "w_proj": w_proj, "b_proj": b_proj}


def reference_forward(x, params, n_head):
    """Pure-JAX f32 reference mirroring the PyTorch module (eval mode)."""
    B, T, C = x.shape
    hd = C // n_head
    w_attn = params["w_attn"].astype(jnp.float32)
    w_proj = params["w_proj"].astype(jnp.float32)
    qkv = x.reshape(B * T, C) @ w_attn + params["b_attn"]
    qkv = qkv.reshape(B, T, 3, n_head, hd)
    q = qkv[:, :, 0].transpose(0, 2, 1, 3)
    k = qkv[:, :, 1].transpose(0, 2, 1, 3)
    v = qkv[:, :, 2].transpose(0, 2, 1, 3)
    s = jnp.einsum("bhqd,bhkd->bhqk", q, k) / math.sqrt(hd)
    mask = jnp.tril(jnp.ones((T, T), bool))
    s = jnp.where(mask, s, -jnp.inf)
    p = jax.nn.softmax(s, axis=-1)
    y = jnp.einsum("bhqk,bhkd->bhqd", p, v)
    y = y.transpose(0, 2, 1, 3).reshape(B * T, C)
    out = y @ w_proj + params["b_proj"]
    return out.reshape(B, T, C)


if __name__ == "__main__":
    # Small config consistent with the module: n_embd % n_head == 0
    B, T, C, n_head = 2, 8, 32, 4

    key = jax.random.PRNGKey(0)
    kx, kp = jax.random.split(key)
    x = jax.random.normal(kx, (B, T, C), jnp.float32)
    params = init_params(kp, C)

    y = causal_self_attention(x, params, n_head=n_head)
    jax.block_until_ready(y)
    assert y.shape == (B, T, C), y.shape

    y_ref = reference_forward(x, params, n_head)
    err = float(jnp.max(jnp.abs(y.astype(jnp.float32) - y_ref)))
    assert err < 2e-2, f"max abs err vs reference: {err}"

    print("KERNEL_OK")
</pallas_src>

<mosaic_0001>
module attributes {stable_mosaic.version = 11 : i64} {
  func.func @_linear_resident_kernel(%arg0: i32, %arg1: memref<16x32xbf16, #tpu.memory_space<vmem>>, %arg2: memref<32x96xbf16, #tpu.memory_space<vmem>>, %arg3: memref<1x96xf32, #tpu.memory_space<vmem>>, %arg4: memref<16x96xbf16, #tpu.memory_space<vmem>>) attributes {dimension_semantics = [#tpu.dimension_semantics<parallel>], iteration_bounds = array<i64: 1>, scalar_prefetch = 0 : i64, scratch_operands = 0 : i64, tpu.core_type = #tpu.core_type<tc>, window_params = [{transform_indices = @transform_0, window_bounds = array<i64: 16, 32>}, {pipeline_mode = #tpu.pipeline_mode<synchronous>, transform_indices = @transform_1, window_bounds = array<i64: 32, 96>}, {pipeline_mode = #tpu.pipeline_mode<synchronous>, transform_indices = @transform_2, window_bounds = array<i64: 1, 96>}, {transform_indices = @transform_3, window_bounds = array<i64: 16, 96>}]} {
    %c0 = arith.constant 0 : index
    %c0_0 = arith.constant 0 : index
    %0 = vector.load %arg1[%c0, %c0_0] : memref<16x32xbf16, #tpu.memory_space<vmem>>, vector<16x32xbf16>
    %c0_1 = arith.constant 0 : index
    %c0_2 = arith.constant 0 : index
    %1 = vector.load %arg2[%c0_1, %c0_2] : memref<32x96xbf16, #tpu.memory_space<vmem>>, vector<32x96xbf16>
    %cst = arith.constant dense<0.000000e+00> : vector<16x96xf32>
    %2 = tpu.matmul %0, %1, %cst {dimension_numbers = #tpu.dot_dimension_numbers<[1], [0], [0], [1], [0, 0, 1, 1], [], []>} : vector<16x32xbf16>, vector<32x96xbf16>, vector<16x96xf32> -> vector<16x96xf32>
    %c0_3 = arith.constant 0 : index
    %c0_4 = arith.constant 0 : index
    %3 = vector.load %arg3[%c0_3, %c0_4] : memref<1x96xf32, #tpu.memory_space<vmem>>, vector<1x96xf32>
    %4 = vector.broadcast %3 : vector<1x96xf32> to vector<16x96xf32>
    %5 = arith.addf %2, %4 : vector<16x96xf32>
    %6 = arith.truncf %5 : vector<16x96xf32> to vector<16x96xbf16>
    %c0_5 = arith.constant 0 : index
    %c0_6 = arith.constant 0 : index
    %7 = vector.load %arg4[%c0_5, %c0_6] : memref<16x96xbf16, #tpu.memory_space<vmem>>, vector<16x96xbf16>
    tpu.vector_store %arg4[%c0_5, %c0_6], %6 {strides = array<i32>} : memref<16x96xbf16, #tpu.memory_space<vmem>>, vector<16x96xbf16>,
    return
  }
  func.func @transform_0(%arg0: i32) -> (i32, i32) {
    %c0_i32 = arith.constant 0 : i32
    %c0_i32_0 = arith.constant 0 : i32
    return %arg0, %c0_i32 : i32, i32
  }
  func.func @transform_1(%arg0: i32) -> (i32, i32) {
    %c0_i32 = arith.constant 0 : i32
    %c0_i32_0 = arith.constant 0 : i32
    %c0_i32_1 = arith.constant 0 : i32
    return %c0_i32, %c0_i32_0 : i32, i32
  }
  func.func @transform_2(%arg0: i32) -> (i32, i32) {
    %c0_i32 = arith.constant 0 : i32
    %c0_i32_0 = arith.constant 0 : i32
    %c0_i32_1 = arith.constant 0 : i32
    return %c0_i32, %c0_i32_0 : i32, i32
  }
  func.func @transform_3(%arg0: i32) -> (i32, i32) {
    %c0_i32 = arith.constant 0 : i32
    %c0_i32_0 = arith.constant 0 : i32
    return %arg0, %c0_i32 : i32, i32
  }
}

module attributes {stable_mosaic.version = 11 : i64} {
  func.func @_flash_attn_kernel(%arg0: i32, %arg1: i32, %arg2: i32, %arg3: i32, %arg4: memref<1x1x8x8xbf16, #tpu.memory_space<vmem>>, %arg5: memref<1x1x8x8xbf16, #tpu.memory_space<vmem>>, %arg6: memref<1x1x8x8xbf16, #tpu.memory_space<vmem>>, %arg7: memref<1x1x8x8xbf16, #tpu.memory_space<vmem>>, %arg8: memref<8x1xf32, #tpu.memory_space<vmem>>, %arg9: memref<8x1xf32, #tpu.memory_space<vmem>>, %arg10: memref<8x8xf32, #tpu.memory_space<vmem>>) attributes {dimension_semantics = [#tpu.dimension_semantics<parallel>, #tpu.dimension_semantics<parallel>, #tpu.dimension_semantics<parallel>, #tpu.dimension_semantics<arbitrary>], iteration_bounds = array<i64: 2, 4, 1, 1>, scalar_prefetch = 0 : i64, scratch_operands = 3 : i64, tpu.core_type = #tpu.core_type<tc>, window_params = [{transform_indices = @transform_0, window_bounds = array<i64: 1, 1, 8, 8>}, {transform_indices = @transform_1, window_bounds = array<i64: 1, 1, 8, 8>}, {transform_indices = @transform_2, window_bounds = array<i64: 1, 1, 8, 8>}, {transform_indices = @transform_3, window_bounds = array<i64: 1, 1, 8, 8>}]} {
    %c0_i32 = arith.constant 0 : i32
    %0 = arith.cmpi eq, %arg3, %c0_i32 : i32
    %1 = arith.extui %0 : i1 to i32
    %c0_i32_0 = arith.constant 0 : i32
    %2 = arith.cmpi ne, %1, %c0_i32_0 : i32
    scf.if %2 {
      %cst = arith.constant 0xFF800000 : f32
      %9 = vector.broadcast %cst : f32 to vector<8x1xf32>
      %c0 = arith.constant 0 : index
      %c0_3 = arith.constant 0 : index
      %10 = vector.load %arg8[%c0, %c0_3] : memref<8x1xf32, #tpu.memory_space<vmem>>, vector<8x1xf32>
      tpu.vector_store %arg8[%c0, %c0_3], %9 {strides = array<i32>} : memref<8x1xf32, #tpu.memory_space<vmem>>, vector<8x1xf32>,
      %cst_4 = arith.constant 0.000000e+00 : f32
      %11 = vector.broadcast %cst_4 : f32 to vector<8x1xf32>
      %c0_5 = arith.constant 0 : index
      %c0_6 = arith.constant 0 : index
      %12 = vector.load %arg9[%c0_5, %c0_6] : memref<8x1xf32, #tpu.memory_space<vmem>>, vector<8x1xf32>
      tpu.vector_store %arg9[%c0_5, %c0_6], %11 {strides = array<i32>} : memref<8x1xf32, #tpu.memory_space<vmem>>, vector<8x1xf32>,
      %cst_7 = arith.constant 0.000000e+00 : f32
      %13 = vector.broadcast %cst_7 : f32 to vector<8x8xf32>
      %c0_8 = arith.constant 0 : index
      %c0_9 = arith.constant 0 : index
      %14 = vector.load %arg10[%c0_8, %c0_9] : memref<8x8xf32, #tpu.memory_space<vmem>>, vector<8x8xf32>
      tpu.vector_store %arg10[%c0_8, %c0_9], %13 {strides = array<i32>} : memref<8x8xf32, #tpu.memory_space<vmem>>, vector<8x8xf32>,
    } else {
    }
    %3 = arith.cmpi slt, %arg3, %arg2 : i32
    %4 = arith.extui %3 : i1 to i32
    %c0_i32_1 = arith.constant 0 : i32
    %5 = arith.cmpi ne, %4, %c0_i32_1 : i32
    scf.if %5 {
      %c0 = arith.constant 0 : index
      %c0_3 = arith.constant 0 : index
      %c0_4 = arith.constant 0 : index
      %c0_5 = arith.constant 0 : index
      %9 = vector.load %arg4[%c0, %c0_3, %c0_4, %c0_5] : memref<1x1x8x8xbf16, #tpu.memory_space<vmem>>, vector<1x1x8x8xbf16>
      %10 = vector.shape_cast %9 : vector<1x1x8x8xbf16> to vector<8x8xbf16>
      %cst = arith.constant 3.535160e-01 : bf16
      %11 = vector.broadcast %cst : bf16 to vector<8x8xbf16>
      %12 = arith.mulf %10, %11 : vector<8x8xbf16>
      %c0_6 = arith.constant 0 : index
      %c0_7 = arith.constant 0 : index
      %c0_8 = arith.constant 0 : index
      %c0_9 = arith.constant 0 : index
      %13 = vector.load %arg5[%c0_6, %c0_7, %c0_8, %c0_9] : memref<1x1x8x8xbf16, #tpu.memory_space<vmem>>, vector<1x1x8x8xbf16>
      %14 = vector.shape_cast %13 : vector<1x1x8x8xbf16> to vector<8x8xbf16>
      %cst_10 = arith.constant dense<0.000000e+00> : vector<8x8xf32>
      %15 = tpu.matmul %12, %14, %cst_10 {dimension_numbers = #tpu.dot_dimension_numbers<[1], [1], [0], [0], [0, 0, 1, 0], [], []>} : vector<8x8xbf16>, vector<8x8xbf16>, vector<8x8xf32> -> vector<8x8xf32>
      %c0_11 = arith.constant 0 : index
      %c0_12 = arith.constant 0 : index
      %16 = vector.load %arg8[%c0_11, %c0_12] : memref<8x1xf32, #tpu.memory_space<vmem>>, vector<8x1xf32>
      %cst_13 = arith.constant dense<0xFF800000> : vector<8xf32>
      %17 = vector.multi_reduction <maximumf>, %15, %cst_13 [1] : vector<8x8xf32> to vector<8xf32>
      %18 = vector.shape_cast %17 : vector<8xf32> to vector<8x1xf32>
      %19 = arith.maximumf %16, %18 : vector<8x1xf32>
      %20 = arith.subf %16, %19 : vector<8x1xf32>
      %21 = math.exp %20 : vector<8x1xf32>
      %22 = vector.broadcast %19 : vector<8x1xf32> to vector<8x8xf32>
      %23 = arith.subf %15, %22 : vector<8x8xf32>
      %24 = math.exp %23 : vector<8x8xf32>
      %c0_14 = arith.constant 0 : index
      %c0_15 = arith.constant 0 : index
      %25 = vector.load %arg9[%c0_14, %c0_15] : memref<8x1xf32, #tpu.memory_space<vmem>>, vector<8x1xf32>
      %26 = arith.mulf %21, %25 : vector<8x1xf32>
      %cst_16 = arith.constant dense<0.000000e+00> : vector<8xf32>
      %27 = vector.multi_reduction <add>, %24, %cst_16 [1] : vector<8x8xf32> to vector<8xf32>
      %28 = vector.shape_cast %27 : vector<8xf32> to vector<8x1xf32>
      %29 = arith.addf %26, %28 : vector<8x1xf32>
      %c0_17 = arith.constant 0 : index
      %c0_18 = arith.constant 0 : index
      %30 = vector.load %arg9[%c0_17, %c0_18] : memref<8x1xf32, #tpu.memory_space<vmem>>, vector<8x1xf32>
      tpu.vector_store %arg9[%c0_17, %c0_18], %29 {strides = array<i32>} : memref<8x1xf32, #tpu.memory_space<vmem>>, vector<8x1xf32>,
      %c0_19 = arith.constant 0 : index
      %c0_20 = arith.constant 0 : index
      %31 = vector.load %arg10[%c0_19, %c0_20] : memref<8x8xf32, #tpu.memory_space<vmem>>, vector<8x8xf32>
      %32 = vector.broadcast %21 : vector<8x1xf32> to vector<8x8xf32>
      %33 = arith.mulf %32, %31 : vector<8x8xf32>
      %34 = arith.truncf %24 : vector<8x8xf32> to vector<8x8xbf16>
      %c0_21 = arith.constant 0 : index
      %c0_22 = arith.constant 0 : index
      %c0_23 = arith.constant 0 : index
      %c0_24 = arith.constant 0 : index
      %35 = vector.load %arg6[%c0_21, %c0_22, %c0_23, %c0_24] : memref<1x1x8x8xbf16, #tpu.memory_space<vmem>>, vector<1x1x8x8xbf16>
      %36 = vector.shape_cast %35 : vector<1x1x8x8xbf16> to vector<8x8xbf16>
      %cst_25 = arith.constant dense<0.000000e+00> : vector<8x8xf32>
      %37 = tpu.matmul %34, %36, %cst_25 {dimension_numbers = #tpu.dot_dimension_numbers<[1], [0], [0], [1], [0, 0, 1, 1], [], []>} : vector<8x8xbf16>, vector<8x8xbf16>, vector<8x8xf32> -> vector<8x8xf32>
      %38 = arith.addf %33, %37 : vector<8x8xf32>
      %c0_26 = arith.constant 0 : index
      %c0_27 = arith.constant 0 : index
      %39 = vector.load %arg10[%c0_26, %c0_27] : memref<8x8xf32, #tpu.memory_space<vmem>>, vector<8x8xf32>
      tpu.vector_store %arg10[%c0_26, %c0_27], %38 {strides = array<i32>} : memref<8x8xf32, #tpu.memory_space<vmem>>, vector<8x8xf32>,
      %c0_28 = arith.constant 0 : index
      %c0_29 = arith.constant 0 : index
      %40 = vector.load %arg8[%c0_28, %c0_29] : memref<8x1xf32, #tpu.memory_space<vmem>>, vector<8x1xf32>
      tpu.vector_store %arg8[%c0_28, %c0_29], %19 {strides = array<i32>} : memref<8x1xf32, #tpu.memory_space<vmem>>, vector<8x1xf32>,
    } else {
    }
    %6 = arith.cmpi eq, %arg3, %arg2 : i32
    %7 = arith.extui %6 : i1 to i32
    %c0_i32_2 = arith.constant 0 : i32
    %8 = arith.cmpi ne, %7, %c0_i32_2 : i32
    scf.if %8 {
      %c0 = arith.constant 0 : index
      %c0_3 = arith.constant 0 : index
      %c0_4 = arith.constant 0 : index
      %c0_5 = arith.constant 0 : index
      %9 = vector.load %arg4[%c0, %c0_3, %c0_4, %c0_5] : memref<1x1x8x8xbf16, #tpu.memory_space<vmem>>, vector<1x1x8x8xbf16>
      %10 = vector.shape_cast %9 : vector<1x1x8x8xbf16> to vector<8x8xbf16>
      %cst = arith.constant 3.535160e-01 : bf16
      %11 = vector.broadcast %cst : bf16 to vector<8x8xbf16>
      %12 = arith.mulf %10, %11 : vector<8x8xbf16>
      %c0_6 = arith.constant 0 : index
      %c0_7 = arith.constant 0 : index
      %c0_8 = arith.constant 0 : index
      %c0_9 = arith.constant 0 : index
      %13 = vector.load %arg5[%c0_6, %c0_7, %c0_8, %c0_9] : memref<1x1x8x8xbf16, #tpu.memory_space<vmem>>, vector<1x1x8x8xbf16>
      %14 = vector.shape_cast %13 : vector<1x1x8x8xbf16> to vector<8x8xbf16>
      %cst_10 = arith.constant dense<0.000000e+00> : vector<8x8xf32>
      %15 = tpu.matmul %12, %14, %cst_10 {dimension_numbers = #tpu.dot_dimension_numbers<[1], [1], [0], [0], [0, 0, 1, 0], [], []>} : vector<8x8xbf16>, vector<8x8xbf16>, vector<8x8xf32> -> vector<8x8xf32>
      %16 = tpu.iota {dimensions = array<i32: 0>} : vector<8x8xi32>
      %17 = tpu.iota {dimensions = array<i32: 1>} : vector<8x8xi32>
      %18 = arith.cmpi sle, %17, %16 : vector<8x8xi32>
      %cst_11 = arith.constant -1.000000e+30 : f32
      %19 = vector.broadcast %cst_11 : f32 to vector<8x8xf32>
      %20 = arith.select %18, %15, %19 : vector<8x8xi1>, vector<8x8xf32>
      %c0_12 = arith.constant 0 : index
      %c0_13 = arith.constant 0 : index
      %21 = vector.load %arg8[%c0_12, %c0_13] : memref<8x1xf32, #tpu.memory_space<vmem>>, vector<8x1xf32>
      %cst_14 = arith.constant dense<0xFF800000> : vector<8xf32>
      %22 = vector.multi_reduction <maximumf>, %20, %cst_14 [1] : vector<8x8xf32> to vector<8xf32>
      %23 = vector.shape_cast %22 : vector<8xf32> to vector<8x1xf32>
      %24 = arith.maximumf %21, %23 : vector<8x1xf32>
      %25 = arith.subf %21, %24 : vector<8x1xf32>
      %26 = math.exp %25 : vector<8x1xf32>
      %27 = vector.broadcast %24 : vector<8x1xf32> to vector<8x8xf32>
      %28 = arith.subf %20, %27 : vector<8x8xf32>
      %29 = math.exp %28 : vector<8x8xf32>
      %c0_15 = arith.constant 0 : index
      %c0_16 = arith.constant 0 : index
      %30 = vector.load %arg9[%c0_15, %c0_16] : memref<8x1xf32, #tpu.memory_space<vmem>>, vector<8x1xf32>
      %31 = arith.mulf %26, %30 : vector<8x1xf32>
      %cst_17 = arith.constant dense<0.000000e+00> : vector<8xf32>
      %32 = vector.multi_reduction <add>, %29, %cst_17 [1] : vector<8x8xf32> to vector<8xf32>
      %33 = vector.shape_cast %32 : vector<8xf32> to vector<8x1xf32>
      %34 = arith.addf %31, %33 : vector<8x1xf32>
      %c0_18 = arith.constant 0 : index
      %c0_19 = arith.constant 0 : index
      %35 = vector.load %arg9[%c0_18, %c0_19] : memref<8x1xf32, #tpu.memory_space<vmem>>, vector<8x1xf32>
      tpu.vector_store %arg9[%c0_18, %c0_19], %34 {strides = array<i32>} : memref<8x1xf32, #tpu.memory_space<vmem>>, vector<8x1xf32>,
      %c0_20 = arith.constant 0 : index
      %c0_21 = arith.constant 0 : index
      %36 = vector.load %arg10[%c0_20, %c0_21] : memref<8x8xf32, #tpu.memory_space<vmem>>, vector<8x8xf32>
      %37 = vector.broadcast %26 : vector<8x1xf32> to vector<8x8xf32>
      %38 = arith.mulf %37, %36 : vector<8x8xf32>
      %39 = arith.truncf %29 : vector<8x8xf32> to vector<8x8xbf16>
      %c0_22 = arith.constant 0 : index
      %c0_23 = arith.constant 0 : index
      %c0_24 = arith.constant 0 : index
      %c0_25 = arith.constant 0 : index
      %40 = vector.load %arg6[%c0_22, %c0_23, %c0_24, %c0_25] : memref<1x1x8x8xbf16, #tpu.memory_space<vmem>>, vector<1x1x8x8xbf16>
      %41 = vector.shape_cast %40 : vector<1x1x8x8xbf16> to vector<8x8xbf16>
      %cst_26 = arith.constant dense<0.000000e+00> : vector<8x8xf32>
      %42 = tpu.matmul %39, %41, %cst_26 {dimension_numbers = #tpu.dot_dimension_numbers<[1], [0], [0], [1], [0, 0, 1, 1], [], []>} : vector<8x8xbf16>, vector<8x8xbf16>, vector<8x8xf32> -> vector<8x8xf32>
      %43 = arith.addf %38, %42 : vector<8x8xf32>
      %c0_27 = arith.constant 0 : index
      %c0_28 = arith.constant 0 : index
      %44 = vector.load %arg10[%c0_27, %c0_28] : memref<8x8xf32, #tpu.memory_space<vmem>>, vector<8x8xf32>
      tpu.vector_store %arg10[%c0_27, %c0_28], %43 {strides = array<i32>} : memref<8x8xf32, #tpu.memory_space<vmem>>, vector<8x8xf32>,
      %c0_29 = arith.constant 0 : index
      %c0_30 = arith.constant 0 : index
      %45 = vector.load %arg8[%c0_29, %c0_30] : memref<8x1xf32, #tpu.memory_space<vmem>>, vector<8x1xf32>
      tpu.vector_store %arg8[%c0_29, %c0_30], %24 {strides = array<i32>} : memref<8x1xf32, #tpu.memory_space<vmem>>, vector<8x1xf32>,
      %c0_31 = arith.constant 0 : index
      %c0_32 = arith.constant 0 : index
      %46 = vector.load %arg9[%c0_31, %c0_32] : memref<8x1xf32, #tpu.memory_space<vmem>>, vector<8x1xf32>
      %47 = tpu.reciprocal %46 {approx = true} : vector<8x1xf32> -> vector<8x1xf32>
      %c0_33 = arith.constant 0 : index
      %c0_34 = arith.constant 0 : index
      %48 = vector.load %arg10[%c0_33, %c0_34] : memref<8x8xf32, #tpu.memory_space<vmem>>, vector<8x8xf32>
      %49 = vector.broadcast %47 : vector<8x1xf32> to vector<8x8xf32>
      %50 = arith.mulf %48, %49 : vector<8x8xf32>
      %51 = arith.truncf %50 : vector<8x8xf32> to vector<8x8xbf16>
      %c0_35 = arith.constant 0 : index
      %c0_36 = arith.constant 0 : index
      %c0_37 = arith.constant 0 : index
      %c0_38 = arith.constant 0 : index
      %52 = vector.load %arg7[%c0_35, %c0_36, %c0_37, %c0_38] : memref<1x1x8x8xbf16, #tpu.memory_space<vmem>>, vector<1x1x8x8xbf16>
      %53 = vector.shape_cast %52 : vector<1x1x8x8xbf16> to vector<8x8xbf16>
      %54 = vector.shape_cast %51 : vector<8x8xbf16> to vector<1x1x8x8xbf16>
      tpu.vector_store %arg7[%c0_35, %c0_36, %c0_37, %c0_38], %54 {strides = array<i32>} : memref<1x1x8x8xbf16, #tpu.memory_space<vmem>>, vector<1x1x8x8xbf16>,
    } else {
    }
    return
  }
  func.func @transform_0(%arg0: i32, %arg1: i32, %arg2: i32, %arg3: i32) -> (i32, i32, i32, i32) {
    %c0_i32 = arith.constant 0 : i32
    %c0_i32_0 = arith.constant 0 : i32
    return %arg0, %arg1, %arg2, %c0_i32 : i32, i32, i32, i32
  }
  func.func @transform_1(%arg0: i32, %arg1: i32, %arg2: i32, %arg3: i32) -> (i32, i32, i32, i32) {
    %0 = arith.minsi %arg3, %arg2 : i32
    %c0_i32 = arith.constant 0 : i32
    %c0_i32_0 = arith.constant 0 : i32
    return %arg0, %arg1, %0, %c0_i32 : i32, i32, i32, i32
  }
  func.func @transform_2(%arg0: i32, %arg1: i32, %arg2: i32, %arg3: i32) -> (i32, i32, i32, i32) {
    %0 = arith.minsi %arg3, %arg2 : i32
    %c0_i32 = arith.constant 0 : i32
    %c0_i32_0 = arith.constant 0 : i32
    return %arg0, %arg1, %0, %c0_i32 : i32, i32, i32, i32
  }
  func.func @transform_3(%arg0: i32, %arg1: i32, %arg2: i32, %arg3: i32) -> (i32, i32, i32, i32) {
    %c0_i32 = arith.constant 0 : i32
    %c0_i32_0 = arith.constant 0 : i32
    return %arg0, %arg1, %arg2, %c0_i32 : i32, i32, i32, i32
  }
}

module attributes {stable_mosaic.version = 11 : i64} {
  func.func @_proj_heads_kernel(%arg0: i32, %arg1: i32, %arg2: memref<1x4x8x8xbf16, #tpu.memory_space<vmem>>, %arg3: memref<4x8x32xbf16, #tpu.memory_space<vmem>>, %arg4: memref<1x32xf32, #tpu.memory_space<vmem>>, %arg5: memref<1x8x32xf32, #tpu.memory_space<vmem>>, %arg6: memref<8x32xf32, #tpu.memory_space<vmem>>) attributes {dimension_semantics = [#tpu.dimension_semantics<parallel>, #tpu.dimension_semantics<parallel>], iteration_bounds = array<i64: 2, 1>, scalar_prefetch = 0 : i64, scratch_operands = 1 : i64, tpu.core_type = #tpu.core_type<tc>, window_params = [{transform_indices = @transform_0, window_bounds = array<i64: 1, 4, 8, 8>}, {pipeline_mode = #tpu.pipeline_mode<synchronous>, transform_indices = @transform_1, window_bounds = array<i64: 4, 8, 32>}, {pipeline_mode = #tpu.pipeline_mode<synchronous>, transform_indices = @transform_2, window_bounds = array<i64: 1, 32>}, {transform_indices = @transform_3, window_bounds = array<i64: 1, 8, 32>}]} {
    %cst = arith.constant 0.000000e+00 : f32
    %0 = vector.broadcast %cst : f32 to vector<8x32xf32>
    %c0 = arith.constant 0 : index
    %c0_0 = arith.constant 0 : index
    %1 = vector.load %arg6[%c0, %c0_0] : memref<8x32xf32, #tpu.memory_space<vmem>>, vector<8x32xf32>
    tpu.vector_store %arg6[%c0, %c0_0], %0 {strides = array<i32>} : memref<8x32xf32, #tpu.memory_space<vmem>>, vector<8x32xf32>,
    %c0_1 = arith.constant 0 : index
    %c0_2 = arith.constant 0 : index
    %2 = vector.load %arg6[%c0_1, %c0_2] : memref<8x32xf32, #tpu.memory_space<vmem>>, vector<8x32xf32>
    %c0_3 = arith.constant 0 : index
    %c0_4 = arith.constant 0 : index
    %c0_5 = arith.constant 0 : index
    %c0_6 = arith.constant 0 : index
    %3 = vector.load %arg2[%c0_3, %c0_4, %c0_5, %c0_6] : memref<1x4x8x8xbf16, #tpu.memory_space<vmem>>, vector<1x1x8x8xbf16>
    %4 = vector.shape_cast %3 : vector<1x1x8x8xbf16> to vector<8x8xbf16>
    %c0_7 = arith.constant 0 : index
    %c0_8 = arith.constant 0 : index
    %c0_9 = arith.constant 0 : index
    %5 = vector.load %arg3[%c0_7, %c0_8, %c0_9] : memref<4x8x32xbf16, #tpu.memory_space<vmem>>, vector<1x8x32xbf16>
    %6 = vector.shape_cast %5 : vector<1x8x32xbf16> to vector<8x32xbf16>
    %cst_10 = arith.constant dense<0.000000e+00> : vector<8x32xf32>
    %7 = tpu.matmul %4, %6, %cst_10 {dimension_numbers = #tpu.dot_dimension_numbers<[1], [0], [0], [1], [0, 0, 1, 1], [], []>} : vector<8x8xbf16>, vector<8x32xbf16>, vector<8x32xf32> -> vector<8x32xf32>
    %8 = arith.addf %2, %7 : vector<8x32xf32>
    %c0_11 = arith.constant 0 : index
    %c0_12 = arith.constant 0 : index
    %9 = vector.load %arg6[%c0_11, %c0_12] : memref<8x32xf32, #tpu.memory_space<vmem>>, vector<8x32xf32>
    tpu.vector_store %arg6[%c0_11, %c0_12], %8 {strides = array<i32>} : memref<8x32xf32, #tpu.memory_space<vmem>>, vector<8x32xf32>,
    %c0_13 = arith.constant 0 : index
    %c0_14 = arith.constant 0 : index
    %10 = vector.load %arg6[%c0_13, %c0_14] : memref<8x32xf32, #tpu.memory_space<vmem>>, vector<8x32xf32>
    %c0_15 = arith.constant 0 : index
    %c1 = arith.constant 1 : index
    %c0_16 = arith.constant 0 : index
    %c0_17 = arith.constant 0 : index
    %11 = vector.load %arg2[%c0_15, %c1, %c0_16, %c0_17] : memref<1x4x8x8xbf16, #tpu.memory_space<vmem>>, vector<1x1x8x8xbf16>
    %12 = vector.shape_cast %11 : vector<1x1x8x8xbf16> to vector<8x8xbf16>
    %c1_18 = arith.constant 1 : index
    %c0_19 = arith.constant 0 : index
    %c0_20 = arith.constant 0 : index
    %13 = vector.load %arg3[%c1_18, %c0_19, %c0_20] : memref<4x8x32xbf16, #tpu.memory_space<vmem>>, vector<1x8x32xbf16>
    %14 = vector.shape_cast %13 : vector<1x8x32xbf16> to vector<8x32xbf16>
    %cst_21 = arith.constant dense<0.000000e+00> : vector<8x32xf32>
    %15 = tpu.matmul %12, %14, %cst_21 {dimension_numbers = #tpu.dot_dimension_numbers<[1], [0], [0], [1], [0, 0, 1, 1], [], []>} : vector<8x8xbf16>, vector<8x32xbf16>, vector<8x32xf32> -> vector<8x32xf32>
    %16 = arith.addf %10, %15 : vector<8x32xf32>
    %c0_22 = arith.constant 0 : index
    %c0_23 = arith.constant 0 : index
    %17 = vector.load %arg6[%c0_22, %c0_23] : memref<8x32xf32, #tpu.memory_space<vmem>>, vector<8x32xf32>
    tpu.vector_store %arg6[%c0_22, %c0_23], %16 {strides = array<i32>} : memref<8x32xf32, #tpu.memory_space<vmem>>, vector<8x32xf32>,
    %c0_24 = arith.constant 0 : index
    %c0_25 = arith.constant 0 : index
    %18 = vector.load %arg6[%c0_24, %c0_25] : memref<8x32xf32, #tpu.memory_space<vmem>>, vector<8x32xf32>
    %c0_26 = arith.constant 0 : index
    %c2 = arith.constant 2 : index
    %c0_27 = arith.constant 0 : index
    %c0_28 = arith.constant 0 : index
    %19 = vector.load %arg2[%c0_26, %c2, %c0_27, %c0_28] : memref<1x4x8x8xbf16, #tpu.memory_space<vmem>>, vector<1x1x8x8xbf16>
    %20 = vector.shape_cast %19 : vector<1x1x8x8xbf16> to vector<8x8xbf16>
    %c2_29 = arith.constant 2 : index
    %c0_30 = arith.constant 0 : index
    %c0_31 = arith.constant 0 : index
    %21 = vector.load %arg3[%c2_29, %c0_30, %c0_31] : memref<4x8x32xbf16, #tpu.memory_space<vmem>>, vector<1x8x32xbf16>
    %22 = vector.shape_cast %21 : vector<1x8x32xbf16> to vector<8x32xbf16>
    %cst_32 = arith.constant dense<0.000000e+00> : vector<8x32xf32>
    %23 = tpu.matmul %20, %22, %cst_32 {dimension_numbers = #tpu.dot_dimension_numbers<[1], [0], [0], [1], [0, 0, 1, 1], [], []>} : vector<8x8xbf16>, vector<8x32xbf16>, vector<8x32xf32> -> vector<8x32xf32>
    %24 = arith.addf %18, %23 : vector<8x32xf32>
    %c0_33 = arith.constant 0 : index
    %c0_34 = arith.constant 0 : index
    %25 = vector.load %arg6[%c0_33, %c0_34] : memref<8x32xf32, #tpu.memory_space<vmem>>, vector<8x32xf32>
    tpu.vector_store %arg6[%c0_33, %c0_34], %24 {strides = array<i32>} : memref<8x32xf32, #tpu.memory_space<vmem>>, vector<8x32xf32>,
    %c0_35 = arith.constant 0 : index
    %c0_36 = arith.constant 0 : index
    %26 = vector.load %arg6[%c0_35, %c0_36] : memref<8x32xf32, #tpu.memory_space<vmem>>, vector<8x32xf32>
    %c0_37 = arith.constant 0 : index
    %c3 = arith.constant 3 : index
    %c0_38 = arith.constant 0 : index
    %c0_39 = arith.constant 0 : index
    %27 = vector.load %arg2[%c0_37, %c3, %c0_38, %c0_39] : memref<1x4x8x8xbf16, #tpu.memory_space<vmem>>, vector<1x1x8x8xbf16>
    %28 = vector.shape_cast %27 : vector<1x1x8x8xbf16> to vector<8x8xbf16>
    %c3_40 = arith.constant 3 : index
    %c0_41 = arith.constant 0 : index
    %c0_42 = arith.constant 0 : index
    %29 = vector.load %arg3[%c3_40, %c0_41, %c0_42] : memref<4x8x32xbf16, #tpu.memory_space<vmem>>, vector<1x8x32xbf16>
    %30 = vector.shape_cast %29 : vector<1x8x32xbf16> to vector<8x32xbf16>
    %cst_43 = arith.constant dense<0.000000e+00> : vector<8x32xf32>
    %31 = tpu.matmul %28, %30, %cst_43 {dimension_numbers = #tpu.dot_dimension_numbers<[1], [0], [0], [1], [0, 0, 1, 1], [], []>} : vector<8x8xbf16>, vector<8x32xbf16>, vector<8x32xf32> -> vector<8x32xf32>
    %32 = arith.addf %26, %31 : vector<8x32xf32>
    %c0_44 = arith.constant 0 : index
    %c0_45 = arith.constant 0 : index
    %33 = vector.load %arg6[%c0_44, %c0_45] : memref<8x32xf32, #tpu.memory_space<vmem>>, vector<8x32xf32>
    tpu.vector_store %arg6[%c0_44, %c0_45], %32 {strides = array<i32>} : memref<8x32xf32, #tpu.memory_space<vmem>>, vector<8x32xf32>,
    %c0_46 = arith.constant 0 : index
    %c0_47 = arith.constant 0 : index
    %34 = vector.load %arg6[%c0_46, %c0_47] : memref<8x32xf32, #tpu.memory_space<vmem>>, vector<8x32xf32>
    %c0_48 = arith.constant 0 : index
    %c0_49 = arith.constant 0 : index
    %35 = vector.load %arg4[%c0_48, %c0_49] : memref<1x32xf32, #tpu.memory_space<vmem>>, vector<1x32xf32>
    %36 = vector.broadcast %35 : vector<1x32xf32> to vector<8x32xf32>
    %37 = arith.addf %34, %36 : vector<8x32xf32>
    %c0_50 = arith.constant 0 : index
    %c0_51 = arith.constant 0 : index
    %c0_52 = arith.constant 0 : index
    %38 = vector.load %arg5[%c0_50, %c0_51, %c0_52] : memref<1x8x32xf32, #tpu.memory_space<vmem>>, vector<1x8x32xf32>
    %39 = vector.shape_cast %38 : vector<1x8x32xf32> to vector<8x32xf32>
    %40 = vector.shape_cast %37 : vector<8x32xf32> to vector<1x8x32xf32>
    tpu.vector_store %arg5[%c0_50, %c0_51, %c0_52], %40 {strides = array<i32>} : memref<1x8x32xf32, #tpu.memory_space<vmem>>, vector<1x8x32xf32>,
    return
  }
  func.func @transform_0(%arg0: i32, %arg1: i32) -> (i32, i32, i32, i32) {
    %c0_i32 = arith.constant 0 : i32
    %c0_i32_0 = arith.constant 0 : i32
    %c0_i32_1 = arith.constant 0 : i32
    return %arg0, %c0_i32, %arg1, %c0_i32_0 : i32, i32, i32, i32
  }
  func.func @transform_1(%arg0: i32, %arg1: i32) -> (i32, i32, i32) {
    %c0_i32 = arith.constant 0 : i32
    %c0_i32_0 = arith.constant 0 : i32
    %c0_i32_1 = arith.constant 0 : i32
    %c0_i32_2 = arith.constant 0 : i32
    return %c0_i32, %c0_i32_0, %c0_i32_1 : i32, i32, i32
  }
  func.func @transform_2(%arg0: i32, %arg1: i32) -> (i32, i32) {
    %c0_i32 = arith.constant 0 : i32
    %c0_i32_0 = arith.constant 0 : i32
    %c0_i32_1 = arith.constant 0 : i32
    return %c0_i32, %c0_i32_0 : i32, i32
  }
  func.func @transform_3(%arg0: i32, %arg1: i32) -> (i32, i32, i32) {
    %c0_i32 = arith.constant 0 : i32
    %c0_i32_0 = arith.constant 0 : i32
    return %arg0, %arg1, %c0_i32 : i32, i32, i32
  }
}

</mosaic_0001>

<bundles_post_ra>
// kernel: causal_self_attention.3
= control target key start
LH: loop header
LB: loop body
LE: loop exit
PB: predicated region body
PF: predicated region fallthrough
CT: control target
= control target key end

     0   :  { %v130_v0 = vmov 0.0   ;;  %vm131_vm0 = vmmov 0   ;;  %vm45_vm1 = vcmask 261120   ;;  %vm98_vm2 = vcmask 781312   ;;  %s170_s1 = inlined_call_operand.vmem [shape: bf16[32,96], index: 1, kind: input, shape index: {}]   ;;  %s171_s0 = inlined_call_operand.vmem [shape: bf16[16,32], index: 0, kind: input, shape index: {}]   ;;  %s172_s2 = inlined_call_operand.vmem [shape: f32[1,96], index: 2, kind: input, shape index: {}]   ;;  %s173_s3 = inlined_call_operand.vmem [shape: bf16[16,96], index: 3, kind: output, shape index: {}]  }
   0x1   :  { %117 = vmatprep.subr.bf16.mxu0 %v130_v0  ;;  %v127_v1 = vld [vmem:[%s170_s1 + $0x8] sm:$0xff]   ;;  %121 = vmatprep.mubr.msk.bf16.mxu0 %vm131_vm0, %v130_v0  ;;  %v128_v2 = vld [vmem:[%s170_s1] sm:$0xff]  }
   0x2   :  { %118 = vmatpush3.bf16.msra.mxu0 %v127_v1  ;;  %v129_v3 = vld [vmem:[%s171_s0] sm:$0xff]  }
   0x3   :  { %119 = vmatprep.subr.bf16.mxu0 %v130_v0  ;;  %v105_v4 = vld [vmem:[%s172_s2] ss:$0 sm:$0xff] }
   0x6   :  { %120 = vmatpush3.bf16.msra.mxu0 %v128_v2 }
   0x9   :  { %122 = vmatmul.mubr.msk.bf16.vlgmr.msra.gmra.mxu0 %vm45_vm1, %v129_v3 }
  0xc9   :  { %v83_v5 = vpop.f32.mrf.mxu0 }
  0xca   :  { %v84_v6 = vadd.f32 %v105_v4, %v83_v5 }
  0xcb   :  { %v123_v7 = vpop.f32.mrf.mxu0 }
  0xcc   :  { %v112_v8 = vpack.c.bf16 %v84_v6, %v84_v6 }
  0xcd   :  { %v86_v9 = vpop.f32.mrf.mxu0 }
  0xce   :  { %99 = vst.msk [vmem:[%s173_s3] sm:$0xf] %vm98_vm2, %v112_v8  ;;  %v87_v10 = vadd.f32 %v105_v4, %v86_v9 }
  0xcf   :  { %v124_v11 = vpop.f32.mrf.mxu0 }
  0xd0   :  { %v113_v12 = vpack.c.bf16 %v87_v10, %v87_v10 }
  0xd2   :  { %100 = vst.msk [vmem:[%s173_s3 + $0x4] sm:$0xf] %vm98_vm2, %v113_v12 }

// kernel: causal_self_attention.5
= control target key start
LH: loop header
LB: loop body
LE: loop exit
PB: predicated region body
PF: predicated region fallthrough
CT: control target
= control target key end

     0   :  { %8 = vsyncpa [#allocation4], 0  ;;  %s854_s0 = inlined_call_operand.vmem [shape: bf16[2,4,8,8], index: 0, kind: input, shape index: {}]   ;;  %s855_s1 = inlined_call_operand.vmem [shape: bf16[4,8,32], index: 1, kind: input, shape index: {}]   ;;  %s856_s2 = inlined_call_operand.vmem [shape: f32[1,32], index: 2, kind: input, shape index: {}]   ;;  %s857_s3 = inlined_call_operand.hbm [shape: f32[2,8,32], index: 3, kind: output, shape index: {}]  }
   0x1   :  { %10 = vsyncpa [#allocation4 + $0x1], 0  ;;  %s722_s12 = smov 0   ;;  %s724_s13 = smov 0  }
   0x2   :  { %s726_s14 = smov 0   ;;  %s728_s15 = smov 0  }
   0x3   :  { %s730_s16 = smov 0   ;;  %s732_s17 = smov 0  }
   0x4 LB: > { %s508_s18 = sadd.s32 4294967295, %s697_s17   ;;  %s509_s19 = sadd.s32 4294967294, %s697_s17   ;;  %s697_s17 = sphi %s732_s17, %s16_s17   ;;  %s693_s16 = sphi %s730_s16, %s864_s16   ;;  %s689_s15 = sphi %s728_s15, %s863_s15   ;;  %s685_s14 = sphi %s726_s14, %s862_s14   ;;  %s681_s13 = sphi %s724_s13, %s861_s13   ;;  %s677_s12 = sphi %s722_s12, %s860_s12  }
   0x5   : > { %s28_s20 = sadd.s32 1, %s693_s16  ;;  %s107_s21 = sadd.s32 1, %s685_s14 }
   0x6   : > { %p30_p0 = scmp.ge.s32.totalorder %s28_s20, 2  ;;  %p117_p1 = scmp.ne.s32.totalorder %s685_s14, %s681_s13 }
   0x7   : > { %p118_p2 = scmp.eq.s32.totalorder %s508_s18, 1  ;;  %p123_p3 = scmp.ne.s32.totalorder %s681_s13, %s677_s12 }
   0x8   : > { %s866_s20 = smov (%p30_p0, %s28_s20), 0  ;;  %p124_p5 = scmp.eq.s32.totalorder %s509_s19, 1 }
   0x9   : > { %p762_p4 = por %p118_p2, %p117_p1  ;;  %s102_s23 = ssub.s32 %s693_s16, %s866_s20 }
   0xa   : > { %p512_p6 = scmp.ge.s32.totalorder %s697_s17, 1  ;;  %p105_p7 = scmp.eq.s32.totalorder %s102_s23, 0 }
   0xb   : > { %p769_p8 = por %p124_p5, %p123_p3  ;;  %p159_p9 = scmp.lt.s32.totalorder %s697_s17, 3 }
   0xc   : > { %s775_s25 = scalar_select %p105_p7, %s685_s14, %s107_s21  }
   0xd   : > { %p160_p10 = pnand %p512_p6, %p159_p9 }
   0xe   : > { %p186_p11 = scmp.lt.s32.totalorder (!%p160_p10), %s689_s15, 1  ;;  %s183_s18 = sand.u32 (!%p160_p10), 1, %s681_s13  }
   0xf   : > { %163 = sbr.rel (%p160_p10) target bundleno = 273 (0x111), region = 32  ;;  %s513_s19 = sshll.u32 (!%p160_p10), %s183_s18, 3 }
  0x10   : > { %s528_s26 = sshll.u32 (!%p160_p10), %s689_s15, 7  ;;  %s185_s27 = scalar_lea.vmem (!%p160_p10), [#allocation3], %s513_s19 }
  0x11   : > { %s434_s28 = sshll.u32 (!%p160_p10), %s185_s27, 4  ;;  %s432_s4 = scalar_lea.hbm (!%p160_p10), %s857_s3, %s528_s26  ;;  %s435_s28 = int_to_ptr.vmem [resolvable:$true] %s434_s28 }
  0x12   : > { %s420_s5 = scalar_lea.sflag (!%p160_p10), [#allocation4], %s183_s18  ;;  %s621_s6 = scalar_lea.vmem (!%p160_p10), %s435_s28, 128 }
  0x13   : > { %p622_p12 = scmp.ne.s32.totalorder (!%p160_p10), %s435_s28, %s621_s6  ;;  %s701_s7 = smov (!%p160_p10), [#allocation3]  }
  0x14   : > { %v199_v0 = vld [vmem:[%s855_s1] sm:$0xf]  ;;  %vm204_vm0 = vcmask 1043456   ;;  %v699_v1 = vmov 0.0   ;;  %vm700_vm1 = vmmov 0   ;;  %s187_s30 = scalar_select %p186_p11, %s689_s15, 1 }
  0x15   : > { %540 = vmatprep.subr.bf16.mxu0 %v699_v1  ;;  %v206_v2 = vsel %vm204_vm0, %v199_v0, 0  ;;  %542 = vmatprep.mubr.msk.bf16.mxu0 %vm700_vm1, %v699_v1  ;;  %v518_v3 = vld [vmem:[%s855_s1 + $0x4] sm:$0xf]  ;;  %v521_v5 = vld [vmem:[%s855_s1 + $0x8] sm:$0xf]  ;;  %vm195_vm2 = vcmask 261120   ;;  %p623_p13 = pnand %p622_p12, %p762_p4 }
  0x16   : > { %541 = vmatpush3.bf16.msra.mxu0 %v206_v2  ;;  %546 = vmatprep.subr.bf16.mxu1 %v699_v1  ;;  %v259_v4 = vsel %vm204_vm0, %v518_v3, 0  ;;  %v524_v6 = vld [vmem:[%s855_s1 + $0xc] sm:$0xf]  ;;  %196 = vst.msk [vmem:[#allocation2] sm:$0xff] %vm195_vm2, %v699_v1  ;;  %s531_s8 = sshll.u32 %s187_s30, 4  ;;  %vm200_vm3 = vcmask 64512  }
  0x17   : > { %547 = vmatpush3.bf16.msra.mxu1 %v259_v4  ;;  %548 = vmatprep.mubr.msk.bf16.mxu1 %vm700_vm1, %v699_v1  ;;  %s193_s11 = scalar_lea.vmem %s854_s0, %s531_s8  ;;  %v312_v7 = vsel %vm204_vm0, %v521_v5, 0  ;;  %v365_v10 = vsel %vm204_vm0, %v524_v6, 0  ;;  %v526_v37 = vld [vmem:[%s856_s2] ss:$0 sm:$0xff]  ;;  %p624_p0 = pneg %p623_p13 }
  0x18   : > { %552 = vmatprep.subr.bf16.mxu0 %v699_v1  ;;  %558 = vmatprep.subr.bf16.mxu1 %v699_v1  ;;  %v198_v8 = vld [vmem:[%s193_s11] sm:$0xf]  ;;  %v517_v9 = vld [vmem:[%s193_s11 + $0x4] sm:$0xf]  ;;  %v520_v11 = vld [vmem:[%s193_s11 + $0x8] sm:$0xf] }
  0x19   : > { %543 = vmatmul.mubr.msk.bf16.vlgmr.msra.gmra.mxu0 %vm200_vm3, %v198_v8  ;;  %v523_v12 = vld [vmem:[%s193_s11 + $0xc] sm:$0xf]  ;;  %s625_s8 = sshll.u32 %s701_s7, 4  ;;  %s626_s8 = int_to_ptr.vmem [resolvable:$false] %s625_s8 }
  0x1a   : > { %549 = vmatmul.mubr.msk.bf16.vlgmr.msra.gmra.mxu1 %vm200_vm3, %v517_v9  ;;  %553 = vmatpush3.bf16.msra.mxu0 %v312_v7  ;;  %s627_s15 = scalar_lea.vmem %s626_s8, 256  ;;  %p628_p1 = scmp.lt.s32.totalorder %s435_s28, %s626_s8 }
  0x1b   : > { %554 = vmatprep.mubr.msk.bf16.mxu0 %vm700_vm1, %v699_v1  ;;  %559 = vmatpush3.bf16.msra.mxu1 %v365_v10  ;;  %p629_p2 = scmp.lt.s32.totalorder %s627_s15, %s621_s6 }
  0x1c   : > { %560 = vmatprep.mubr.msk.bf16.mxu1 %vm700_vm1, %v699_v1 }
  0x1d   : > { %v197_v13 = vld [vmem:[#allocation2] sm:$0xff]  ;;  %p630_p3 = por %p629_p2, %p628_p1 }
  0x1f   : > { %p631_p5 = pnand %p630_p3, %p624_p0 }
  0x21   : > { %555 = vmatmul.mubr.msk.bf16.vlgmr.msra.gmra.mxu0 %vm200_vm3, %v520_v11 }
  0x22   : > { %561 = vmatmul.mubr.msk.bf16.vlgmr.msra.gmra.mxu1 %vm200_vm3, %v523_v12 }
  0xd9   : > { %v242_v14 = vpop.f32.mrf.mxu0 }
  0xda   : > { %v295_v15 = vpop.f32.mrf.mxu1  ;;  %v248_v16 = vadd.f32 %v242_v14, %v197_v13 }
  0xdb   : > { %v544_v17 = vpop.f32.mrf.mxu0 }
  0xdc   : > { %v550_v18 = vpop.f32.mrf.mxu1  ;;  %249 = vst.msk [vmem:[#allocation2] sm:$0xff] %vm195_vm2, %v248_v16 }
  0xdd   : > { %v245_v19 = vpop.f32.mrf.mxu0 }
  0xde   : > { %v298_v20 = vpop.f32.mrf.mxu1 }
  0xdf   : > { %v545_v21 = vpop.f32.mrf.mxu0 }
  0xe0   : > { %v551_v22 = vpop.f32.mrf.mxu1 }
  0xe1   : > { %v348_v23 = vpop.f32.mrf.mxu0 }
  0xe2   : > { %v401_v24 = vpop.f32.mrf.mxu1 }
  0xe3   : > { %v250_v25 = vld [vmem:[#allocation2] sm:$0xff]  ;;  %v556_v26 = vpop.f32.mrf.mxu0 }
  0xe4   : > { %v562_v27 = vpop.f32.mrf.mxu1  ;;  %v301_v28 = vadd.f32 %v295_v15, %v250_v25 }
  0xe5   : > { %v351_v29 = vpop.f32.mrf.mxu0 }
  0xe6   : > { %v404_v30 = vpop.f32.mrf.mxu1  ;;  %302 = vst.msk [vmem:[#allocation2] sm:$0xff] %vm195_vm2, %v301_v28 }
  0xe7   : > { %v557_v31 = vpop.f32.mrf.mxu0 }
  0xe8   : > { %v563_v32 = vpop.f32.mrf.mxu1 }
  0xed   : > { %v303_v33 = vld [vmem:[#allocation2] sm:$0xff] }
  0xee   : > { %v354_v34 = vadd.f32 %v348_v23, %v303_v33 }
  0xf0   : > { %355 = vst.msk [vmem:[#allocation2] sm:$0xff] %vm195_vm2, %v354_v34 }
  0xf7   : > { %v356_v35 = vld [vmem:[#allocation2] sm:$0xff] }
  0xf8   : > { %v407_v36 = vadd.f32 %v401_v24, %v356_v35 }
  0xfa   : > { %408 = vst.msk [vmem:[#allocation2] sm:$0xff] %vm195_vm2, %v407_v36 }
 0x101   : > { %v409_v38 = vld [vmem:[#allocation2] sm:$0xff] }
 0x102   : > { %v417_v39 = vadd.f32 %v526_v37, %v409_v38 }
 0x104   : > { %418 = vst.msk [vmem:[%s185_s27] sm:$0xff] %vm195_vm2, %v417_v39 }
 0x105   : > { %634 = shalt.err (!%p631_p5)
}
 0x106   : > { %s635_s9 = scalar_lea.hbm %s432_s4, 128  ;;  %s639_s18 = scalar_lea.hbm %s857_s3, 256 }
 0x107   : > { %p636_p6 = scmp.ne.s32.totalorder %s432_s4, %s635_s9  ;;  %p640_p10 = scmp.lt.s32.totalorder %s432_s4, %s857_s3 }
 0x108   : > { %p641_p11 = scmp.lt.s32.totalorder %s639_s18, %s635_s9 }
 0x109   : > { %p637_p7 = pnand %p636_p6, %p762_p4 }
 0x10a   : > { %p642_p12 = por %p641_p11, %p640_p10 }
 0x10b   : > { %p638_p9 = pneg %p637_p7 }
 0x10d   : > { %p643_p13 = pnand %p642_p12, %p638_p9 }
 0x10f   : > { %646 = shalt.err (!%p643_p13)
}
 0x110   : > { %564 = dma.vmem_to_hbm [thread:$0]  (%p762_p4), %s435_s28, 128, %s432_s4, %s420_s5  }
 0x111 PF: > { %p570_p0 = scmp.ge.s32.totalorder %s697_s17, 2  ;;  %s446_s23 = sand.u32 1, %s677_s12  }
 0x112   : > { %s447_s26 = scalar_lea.sflag [#allocation4], %s446_s23 }
 0x113   : > { %p567_p1 = pnand %p570_p0, %p769_p8 }
 0x115   : > { %p568_p2 = pneg %p567_p1 }
 0x117   : > { %672 = dma.done.wait (%p568_p2), %s447_s26, 128  }
 0x118   : > { %674 = vsyncadd (%p568_p2), %s447_s26, 4294967168  ;;  %s16_s17 = sadd.s32 1, %s697_s17   ;;  %s860_s12 = smov %s681_s13 }
 0x119   : > { %p13_p3 = scmp.ge.s32.totalorder %s16_s17, 4   ;;  %s861_s13 = smov %s685_s14 }
 0x11a   : > { %s862_s14 = smov %s775_s25  ;;  %s863_s15 = smov %s693_s16 }
 0x11b   : > { %s864_s16 = smov %s866_s20  ;;  %15 = sbr.rel (!%p13_p3) target bundleno = 4 (0x4), region = 73 }
 0x120   :  { %452 = vsyncpa [#allocation4], 1 }
 0x121   :  { %454 = vsyncpa [#allocation4 + $0x1], 1 }

// kernel: causal_self_attention.4
= control target key start
LH: loop header
LB: loop body
LE: loop exit
PB: predicated region body
PF: predicated region fallthrough
CT: control target
= control target key end

     0   :  { %s948_s12 = smov 0   ;;  %s950_s13 = smov 0   ;;  %s1022_s0 = inlined_call_operand.vmem [shape: bf16[2,4,8,8], index: 0, kind: input, shape index: {}]   ;;  %s1023_s1 = inlined_call_operand.vmem [shape: bf16[2,4,8,8], index: 1, kind: input, shape index: {}]   ;;  %s1024_s2 = inlined_call_operand.vmem [shape: bf16[2,4,8,8], index: 2, kind: input, shape index: {}]   ;;  %s1025_s3 = inlined_call_operand.vmem [shape: bf16[2,4,8,8], index: 3, kind: output, shape index: {}]  }
   0x1   :  { %s952_s14 = smov 0   ;;  %s954_s15 = smov 0  }
   0x2   :  { %s956_s16 = smov 0  }
   0x3 LB: > { %s35_s17 = sadd.s32 1, %s914_s14  ;;  %s39_s18 = sadd.s32 1, %s918_s15  ;;  %s922_s16 = sphi %s956_s16, %s13_s16   ;;  %s918_s15 = sphi %s954_s15, %s1029_s15   ;;  %s914_s14 = sphi %s952_s14, %s1028_s14   ;;  %s910_s13 = sphi %s950_s13, %s1027_s13   ;;  %s906_s12 = sphi %s948_s12, %s1026_s12  }
   0x4   : > { %p37_p0 = scmp.ge.s32.totalorder %s35_s17, 4  ;;  %p801_p1 = scmp.ge.s32.totalorder %s922_s16, 1 }
   0x5   : > { %p233_p2 = scmp.lt.s32.totalorder %s922_s16, 9 }
   0x6   : > { %s1031_s17 = smov (%p37_p0, %s35_s17), 0  ;;  %s1033_s18 = smov (!%p37_p0, %s39_s18), %s918_s15 }
   0x7   : > { %p234_p3 = pnand %p801_p1, %p233_p2  ;;  %p41_p4 = scmp.ge.s32.totalorder %s1033_s18, 2 }
   0x8   : > { %p295_p5 = scmp.lt.s32.totalorder (!%p234_p3), %s910_s13, 1  ;;  %p297_p6 = scmp.lt.s32.totalorder (!%p234_p3), %s906_s12, 3 }
   0x9   : > { %s1035_s18 = smov (%p41_p4, %s1033_s18), 0  ;;  %237 = sbr.rel (%p234_p3) target bundleno = 797 (0x31d), region = 32 }
   0xe   : > { %vm356_vm0 = vcmask 64512   ;;  %v924_v0 = vmov 0.0   ;;  %vm925_vm1 = vmmov 0   ;;  %s1037_s13 = smov (!%p295_p5, %s910_s13), 1  ;;  %s1039_s12 = smov (!%p297_p6, %s906_s12), 3  ;;  %vm353_vm2 = vcmask 7168  }
   0xf   : > { %820 = vmatprep.subr.bf16.mxu0 %v924_v0  ;;  %357 = vst.msk [vmem:[#allocation4] sm:$0xff] %vm356_vm0, %v924_v0  ;;  %822 = vmatprep.mubr.msk.bf16.mxu0 %vm925_vm1, %v924_v0  ;;  %s802_s19 = sshll.u32 %s1037_s13, 2  ;;  %v926_v5 = vmov -inf   ;;  %v549_v6 = vlaneseq  ;;  %v927_v15 = vmov 0   ;;  %vm591_vm4 = vcmask 1043456  }
  0x10   : > { %826 = vmatprep.subr.bf16.mxu1 %v924_v0  ;;  %828 = vmatprep.mubr.msk.bf16.mxu1 %vm925_vm1, %v924_v0  ;;  %s303_s20 = sadd.s32 %s802_s19, %s1039_s12  ;;  %354 = vst.msk [vmem:[#allocation2] sm:$0xff] %vm353_vm2, %v926_v5  ;;  %355 = vst.msk [vmem:[#allocation3] sm:$0xff] %vm353_vm2, %v924_v0  ;;  %vm648_vm5 = vcmask 60416  }
  0x11   : > { %s979_s21 = sshll.u32 %s303_s20, 2  ;;  %v550_v7 = vshrl.u32 %v549_v6, 7  ;;  %v552_v8 = vand.u32 127, %v549_v6  ;;  %876 = vset.pattern.permute.xlu0 %v927_v15  ;;  %877 = vset.pattern.permute.xlu1 %v927_v15 }
  0x12   : > { %s318_s24 = scalar_lea.vmem %s1023_s1, %s979_s21  ;;  %s305_s27 = scalar_lea.vmem %s1022_s0, %s979_s21 }
  0x13   : > { %v501_v1 = vld [vmem:[%s318_s24] sm:$0xf]  ;;  %vm553_vm3 = vcmp.le.s32.totalorder %v552_v8, %v550_v7  ;;  %s333_s30 = scalar_lea.vmem %s1024_s2, %s979_s21  ;;  %s346_s6 = scalar_lea.vmem %s1025_s3, %s979_s21 }
  0x14   : > { %v507_v2 = vsel %vm356_vm0, %v501_v1, 0  ;;  %v499_v3 = vld [vmem:[%s305_s27] sm:$0xf] }
  0x15   : > { %821 = vmatpush3.bf16.xpose.msra.mxu0 %v507_v2  ;;  %v500_v4 = vmul.bf16 1052065461, %v499_v3  ;;  %v587_v20 = vld [vmem:[%s333_s30] sm:$0xf] }
  0x16   : > { %v593_v21 = vsel %vm591_vm4, %v587_v20, 0  ;;  %v579_v36 = vld [vmem:[#allocation4] sm:$0xff] }
  0x17   : > { %v555_v16 = vld [vmem:[#allocation2] sm:$0xff]  ;;  %827 = vmatpush3.bf16.msra.mxu1 %v593_v21  ;;  %v571_v30 = vld [vmem:[#allocation3] sm:$0xff] }
  0x1c   : > { %823 = vmatmul.mubr.msk.bf16.vlgmr.msra.gmra.mxu0 %vm356_vm0, %v500_v4 }
  0xdc   : > { %v543_v9 = vpop.f32.mrf.mxu0 }
  0xdd   : > { %v554_v10 = vsel %vm553_vm3, %v543_v9, -1e+30 }
  0xde   : > { %v824_v11 = vpop.f32.mrf.mxu0  ;;  %v556_v12 = vsel %vm356_vm0, %v554_v10, -inf }
  0xdf   : > { %557 = vmax.xlane.f32.xlu0 %v556_v12 }
  0xe0   : > { %v546_v13 = vpop.f32.mrf.mxu0 }
  0xe2   : > { %v825_v14 = vpop.f32.mrf.mxu0 }
 0x168   : > { %v558_v17 = vpop.xlane.xlu0 %557 }
 0x169   : > { %v559_v18 = vmax.f32 %v555_v16, %v558_v17 }
 0x16b   : > { %v560_v19 = vsub.f32 %v555_v16, %v559_v18  ;;  %637 = vst.msk [vmem:[#allocation2] sm:$0xff] %vm353_vm2, %v559_v18  ;;  %565 = vperm.xlu0 %876, %v559_v18  }
 0x16d   : > { %v561_v26 = vmul.f32 1.442695, %v560_v19 }
 0x1e6   : > { %v566_v22 = vpop.permute.xlu0 %565 }
 0x1e7   : > { %v568_v23 = vsub.f32 %v554_v10, %v566_v22 }
 0x1e9   : > { %v569_v24 = vmul.f32 1.442695, %v568_v23 }
 0x1eb   : > { %878 = vpow2.f32 %v569_v24 }
 0x1ec   : > { %880 = vpow2.f32 %v561_v26 }
 0x1f8   : > { %v879_v25 = vpop.eup %878 }
 0x1f9   : > { %v573_v27 = vsel %vm356_vm0, %v879_v25, 0.0  ;;  %v586_v28 = vpack.c.bf16 %v879_v25, %v879_v25  ;;  %v881_v29 = vpop.eup %880 }
 0x1fa   : > { %574 = vadd.xlane.f32.xlu1 %v573_v27  ;;  %v572_v31 = vmul.f32 %v881_v29, %v571_v30 }
 0x1fb   : > { %829 = vmatmul.mubr.msk.bf16.vlgmr.msra.gmra.mxu1 %vm356_vm0, %v586_v28 }
 0x20b   : > { %582 = vperm.xlu1 %877, %v881_v29  }
 0x283   : > { %v575_v32 = vpop.xlane.xlu1 %574 }
 0x284   : > { %v576_v33 = vadd.f32 %v575_v32, %v572_v31 }
 0x286   : > { %578 = vst.msk [vmem:[#allocation3] sm:$0xff] %vm353_vm2, %v576_v33 }
 0x287   : > { %v583_v37 = vpop.permute.xlu1 %582 }
 0x288   : > { %v585_v38 = vmul.f32 %v583_v37, %v579_v36 }
 0x28d   : > { %v638_v34 = vld [vmem:[#allocation3] sm:$0xff] }
 0x28e   : > { %882 = vrcp.f32 %v638_v34 }
 0x29b   : > { %v883_v35 = vpop.eup %882 }
 0x29c   : > { %643 = vperm.xlu1 %877, %v883_v35  }
 0x2bb   : > { %v629_v39 = vpop.f32.mrf.mxu1 }
 0x2bc   : > { %v635_v40 = vadd.f32 %v629_v39, %v585_v38 }
 0x2bd   : > { %v830_v41 = vpop.f32.mrf.mxu1 }
 0x2be   : > { %636 = vst.msk [vmem:[#allocation4] sm:$0xff] %vm356_vm0, %v635_v40 }
 0x2bf   : > { %v632_v42 = vpop.f32.mrf.mxu1 }
 0x2c1   : > { %v831_v43 = vpop.f32.mrf.mxu1 }
 0x2c5   : > { %v640_v44 = vld [vmem:[#allocation4] sm:$0xff] }
 0x317   : > { %v644_v45 = vpop.permute.xlu1 %643 }
 0x318   : > { %v646_v46 = vmul.f32 %v644_v45, %v640_v44 }
 0x31a   : > { %v647_v47 = vpack.c.bf16 %v646_v46, %v646_v46 }
 0x31c   : > { %649 = vst.msk [vmem:[%s346_s6] sm:$0xf] %vm648_vm5, %v647_v47 }
 0x31d PF: > { %s13_s16 = sadd.s32 1, %s922_s16   ;;  %s1026_s12 = smov %s914_s14 }
 0x31e   : > { %p10_p7 = scmp.ge.s32.totalorder %s13_s16, 10   ;;  %s1027_s13 = smov %s918_s15 }
 0x31f   : > { %s1028_s14 = smov %s1031_s17  ;;  %s1029_s15 = smov %s1035_s18 }
 0x320   :  { %12 = sbr.rel (!%p10_p7) target bundleno = 3 (0x3), region = 80 }

</bundles_post_ra>
